<compile_context>
chip_gen: v7x
topology: tpu7x:2x2x1
jax: 0.10.0
libtpu: 0.0.40
codegen_flags: <defaults>
</compile_context>

<pallas_src>
import jax
import jax.numpy as jnp
from jax.experimental import pallas as pl
from jax.experimental.pallas import tpu as pltpu


def mlp_kernel(x_ref,
               w1_ref, b1_ref,     # (32, 1), (32, 1)
               w2_ref, b2_ref,     # (16, 32), (16, 1)
               w3_ref, b3_ref,     # (8, 16),  (8, 1)
               w4_ref, b4_ref,     # (8, 1),   (1, 1)
               o_ref):             # (1, TILE_B)
    # Layer 1 (1 -> 32): K=1 matmul == outer product.  One explicit sublane
    # broadcast of x, then pure VPU broadcast-FMA (no MXU round trip).
    x = x_ref[...]                                               # (1, TILE_B)
    xb = jnp.broadcast_to(x, (w1_ref.shape[0], x.shape[1]))      # (32, TILE_B)
    h = jnp.maximum(w1_ref[...] * xb + b1_ref[...], 0.0)         # (32, TILE_B)

    # Layers 2-3 stay on the MXU: contraction is over the sublane (feature)
    # axis of an already-correctly-laid-out activation, and the otherwise-idle
    # MXU keeps this work off the VPU slots.
    h = jnp.dot(w2_ref[...], h, preferred_element_type=jnp.float32) + b2_ref[...]
    h = jnp.maximum(h, 0.0)                                      # (16, TILE_B)

    h = jnp.dot(w3_ref[...], h, preferred_element_type=jnp.float32) + b3_ref[...]
    h = jnp.maximum(h, 0.0)                                      # (8, TILE_B)

    # Layer 4 (8 -> 1): output-dim=1 matmul == weighted sum over 8 sublanes
    # (XLU reduce), then a lane-dense unmasked (1, TILE_B) store.
    o_ref[...] = (jnp.sum(w4_ref[...] * h, axis=0, keepdims=True)
                  + b4_ref[...])                                 # (1, TILE_B)


def net_forward(x, params, tile_b=8192):
    """x: (B, 1) f32. params: torch-style ((W, b), ...) with W (out,in), b (out,).
    Returns (B, 1) f32, identical semantics to Net.forward (no final activation)."""
    B = x.shape[0]
    (w1, b1), (w2, b2), (w3, b3), (w4, b4) = params

    # Kernel-side layouts (biases as column vectors so they broadcast over lanes).
    w1c = w1.astype(jnp.float32)                 # (32, 1)
    b1c = b1.reshape(32, 1).astype(jnp.float32)
    w2c = w2.astype(jnp.float32)                 # (16, 32)
    b2c = b2.reshape(16, 1).astype(jnp.float32)
    w3c = w3.astype(jnp.float32)                 # (8, 16)
    b3c = b3.reshape(8, 1).astype(jnp.float32)
    w4c = w4.T.astype(jnp.float32)               # (8, 1)
    b4c = b4.reshape(1, 1).astype(jnp.float32)

    # ---- Tile selection ------------------------------------------------------
    # Large fixed default tile amortizes per-grid-step overhead.  For batches
    # smaller than one tile we (a) shrink to the lane-aligned batch so tiny
    # batches are not padded to 8192, and (b) halve the tile when possible so
    # the "parallel" grid has >= 2 steps and can shard across v7x's two TCs.
    tile_b = max(128, (int(tile_b) // 128) * 128)
    b128 = -(-B // 128) * 128                    # lane-aligned batch
    tile_b = min(tile_b, b128)
    if b128 >= 256:
        tile_b = min(tile_b, (b128 // 2) // 128 * 128)
    n_tiles = -(-B // tile_b)
    Bp = n_tiles * tile_b

    # ---- Zero-copy input repack ----------------------------------------------
    # (B, 1) f32 -> (1, B) is a free reshape (bit-identical layout).  Only the
    # tail remainder is padded, as a single XLA pad op; no pad/slice at all when
    # B is already a tile multiple.
    xr = x.astype(jnp.float32).reshape(1, B)
    xt = xr if Bp == B else jnp.pad(xr, ((0, 0), (0, Bp - B)))

    def const_spec(a):
        # Full-array block, constant index_map -> stays VMEM-resident across steps.
        return pl.BlockSpec(a.shape, lambda i: (0, 0))

    out_t = pl.pallas_call(
        mlp_kernel,
        out_shape=jax.ShapeDtypeStruct((1, Bp), jnp.float32),
        grid=(n_tiles,),
        in_specs=[pl.BlockSpec((1, tile_b), lambda i: (0, i)),
                  const_spec(w1c), const_spec(b1c),
                  const_spec(w2c), const_spec(b2c),
                  const_spec(w3c), const_spec(b3c),
                  const_spec(w4c), const_spec(b4c)],
        out_specs=pl.BlockSpec((1, tile_b), lambda i: (0, i)),
        compiler_params=pltpu.CompilerParams(
            dimension_semantics=("parallel",)),
    )(xt, w1c, b1c, w2c, b2c, w3c, b3c, w4c, b4c)

    out = out_t if Bp == B else out_t[:, :B]
    return out.reshape(B, 1)                     # free: (1, B) -> (B, 1)


def init_params(key):
    """Deterministic init mimicking torch.nn.Linear's U(-1/sqrt(fan_in), +1/sqrt(fan_in)).
    Stored torch-style: W with shape (out, in), b with shape (out,)."""
    dims = [(1, 32), (32, 16), (16, 8), (8, 1)]
    params = []
    for fan_in, fan_out in dims:
        kw, kb, key = jax.random.split(key, 3)
        bound = 1.0 / float(fan_in) ** 0.5
        w = jax.random.uniform(kw, (fan_out, fan_in), jnp.float32, -bound, bound)
        b = jax.random.uniform(kb, (fan_out,), jnp.float32, -bound, bound)
        params.append((w, b))
    return tuple(params)


def reference_forward(x, params):
    h = x
    for i, (w, b) in enumerate(params):
        h = h @ w.T + b
        if i < len(params) - 1:
            h = jnp.maximum(h, 0.0)
    return h


if __name__ == "__main__":
    key = jax.random.PRNGKey(0)
    kx, kx2, kx3, kp = jax.random.split(key, 4)
    params = init_params(kp)

    # Small primary check (single tile, padded tail).
    B = 8
    x = jax.random.normal(kx, (B, 1), jnp.float32)
    out = jax.block_until_ready(net_forward(x, params))
    ref = reference_forward(x, params)
    assert out.shape == (B, 1), out.shape
    assert jnp.allclose(out, ref, atol=1e-5, rtol=1e-5), (out, ref)

    # Padding + multi-tile grid check.
    B2 = 300
    x2 = jax.random.normal(kx2, (B2, 1), jnp.float32)
    out2 = jax.block_until_ready(net_forward(x2, params))
    ref2 = reference_forward(x2, params)
    assert out2.shape == (B2, 1), out2.shape
    assert jnp.allclose(out2, ref2, atol=1e-5, rtol=1e-5)

    # Exact tile multiple -> zero-copy path (no pad, no slice), 2-step grid.
    B3 = 1024
    x3 = jax.random.normal(kx3, (B3, 1), jnp.float32)
    out3 = jax.block_until_ready(net_forward(x3, params))
    ref3 = reference_forward(x3, params)
    assert out3.shape == (B3, 1), out3.shape
    assert jnp.allclose(out3, ref3, atol=1e-5, rtol=1e-5)

    print("KERNEL_OK")
</pallas_src>

<mosaic_0001>
module attributes {stable_mosaic.version = 11 : i64} {
  func.func @mlp_kernel(%arg0: i32, %arg1: memref<1x128xf32, #tpu.memory_space<vmem>>, %arg2: memref<32x1xf32, #tpu.memory_space<vmem>>, %arg3: memref<32x1xf32, #tpu.memory_space<vmem>>, %arg4: memref<16x32xf32, #tpu.memory_space<vmem>>, %arg5: memref<16x1xf32, #tpu.memory_space<vmem>>, %arg6: memref<8x16xf32, #tpu.memory_space<vmem>>, %arg7: memref<8x1xf32, #tpu.memory_space<vmem>>, %arg8: memref<8x1xf32, #tpu.memory_space<vmem>>, %arg9: memref<1x1xf32, #tpu.memory_space<vmem>>, %arg10: memref<1x128xf32, #tpu.memory_space<vmem>>) attributes {dimension_semantics = [#tpu.dimension_semantics<parallel>], iteration_bounds = array<i64: 1>, scalar_prefetch = 0 : i64, scratch_operands = 0 : i64, tpu.core_type = #tpu.core_type<tc>, window_params = [{transform_indices = @transform_0, window_bounds = array<i64: 1, 128>}, {pipeline_mode = #tpu.pipeline_mode<synchronous>, transform_indices = @transform_1, window_bounds = array<i64: 32, 1>}, {pipeline_mode = #tpu.pipeline_mode<synchronous>, transform_indices = @transform_2, window_bounds = array<i64: 32, 1>}, {pipeline_mode = #tpu.pipeline_mode<synchronous>, transform_indices = @transform_3, window_bounds = array<i64: 16, 32>}, {pipeline_mode = #tpu.pipeline_mode<synchronous>, transform_indices = @transform_4, window_bounds = array<i64: 16, 1>}, {pipeline_mode = #tpu.pipeline_mode<synchronous>, transform_indices = @transform_5, window_bounds = array<i64: 8, 16>}, {pipeline_mode = #tpu.pipeline_mode<synchronous>, transform_indices = @transform_6, window_bounds = array<i64: 8, 1>}, {pipeline_mode = #tpu.pipeline_mode<synchronous>, transform_indices = @transform_7, window_bounds = array<i64: 8, 1>}, {pipeline_mode = #tpu.pipeline_mode<synchronous>, transform_indices = @transform_8, window_bounds = array<i64: 1, 1>}, {transform_indices = @transform_9, window_bounds = array<i64: 1, 128>}]} {
    %c0 = arith.constant 0 : index
    %c0_0 = arith.constant 0 : index
    %0 = vector.load %arg1[%c0, %c0_0] : memref<1x128xf32, #tpu.memory_space<vmem>>, vector<1x128xf32>
    %1 = vector.shape_cast %0 : vector<1x128xf32> to vector<1x128xf32>
    %2 = vector.broadcast %1 : vector<1x128xf32> to vector<32x128xf32>
    %c0_1 = arith.constant 0 : index
    %c0_2 = arith.constant 0 : index
    %3 = vector.load %arg2[%c0_1, %c0_2] : memref<32x1xf32, #tpu.memory_space<vmem>>, vector<32x1xf32>
    %4 = vector.broadcast %3 : vector<32x1xf32> to vector<32x128xf32>
    %5 = arith.mulf %4, %2 : vector<32x128xf32>
    %c0_3 = arith.constant 0 : index
    %c0_4 = arith.constant 0 : index
    %6 = vector.load %arg3[%c0_3, %c0_4] : memref<32x1xf32, #tpu.memory_space<vmem>>, vector<32x1xf32>
    %7 = vector.broadcast %6 : vector<32x1xf32> to vector<32x128xf32>
    %8 = arith.addf %5, %7 : vector<32x128xf32>
    %cst = arith.constant 0.000000e+00 : f32
    %9 = vector.broadcast %cst : f32 to vector<32x128xf32>
    %10 = arith.maximumf %8, %9 : vector<32x128xf32>
    %c0_5 = arith.constant 0 : index
    %c0_6 = arith.constant 0 : index
    %11 = vector.load %arg4[%c0_5, %c0_6] : memref<16x32xf32, #tpu.memory_space<vmem>>, vector<16x32xf32>
    %cst_7 = arith.constant dense<0.000000e+00> : vector<16x128xf32>
    %12 = tpu.matmul %11, %10, %cst_7 {dimension_numbers = #tpu.dot_dimension_numbers<[1], [0], [0], [1], [0, 0, 1, 1], [], []>} : vector<16x32xf32>, vector<32x128xf32>, vector<16x128xf32> -> vector<16x128xf32>
    %c0_8 = arith.constant 0 : index
    %c0_9 = arith.constant 0 : index
    %13 = vector.load %arg5[%c0_8, %c0_9] : memref<16x1xf32, #tpu.memory_space<vmem>>, vector<16x1xf32>
    %14 = vector.broadcast %13 : vector<16x1xf32> to vector<16x128xf32>
    %15 = arith.addf %12, %14 : vector<16x128xf32>
    %cst_10 = arith.constant 0.000000e+00 : f32
    %16 = vector.broadcast %cst_10 : f32 to vector<16x128xf32>
    %17 = arith.maximumf %15, %16 : vector<16x128xf32>
    %c0_11 = arith.constant 0 : index
    %c0_12 = arith.constant 0 : index
    %18 = vector.load %arg6[%c0_11, %c0_12] : memref<8x16xf32, #tpu.memory_space<vmem>>, vector<8x16xf32>
    %cst_13 = arith.constant dense<0.000000e+00> : vector<8x128xf32>
    %19 = tpu.matmul %18, %17, %cst_13 {dimension_numbers = #tpu.dot_dimension_numbers<[1], [0], [0], [1], [0, 0, 1, 1], [], []>} : vector<8x16xf32>, vector<16x128xf32>, vector<8x128xf32> -> vector<8x128xf32>
    %c0_14 = arith.constant 0 : index
    %c0_15 = arith.constant 0 : index
    %20 = vector.load %arg7[%c0_14, %c0_15] : memref<8x1xf32, #tpu.memory_space<vmem>>, vector<8x1xf32>
    %21 = vector.broadcast %20 : vector<8x1xf32> to vector<8x128xf32>
    %22 = arith.addf %19, %21 : vector<8x128xf32>
    %cst_16 = arith.constant 0.000000e+00 : f32
    %23 = vector.broadcast %cst_16 : f32 to vector<8x128xf32>
    %24 = arith.maximumf %22, %23 : vector<8x128xf32>
    %c0_17 = arith.constant 0 : index
    %c0_18 = arith.constant 0 : index
    %25 = vector.load %arg8[%c0_17, %c0_18] : memref<8x1xf32, #tpu.memory_space<vmem>>, vector<8x1xf32>
    %26 = vector.broadcast %25 : vector<8x1xf32> to vector<8x128xf32>
    %27 = arith.mulf %26, %24 : vector<8x128xf32>
    %cst_19 = arith.constant dense<0.000000e+00> : vector<128xf32>
    %28 = vector.multi_reduction <add>, %27, %cst_19 [0] : vector<8x128xf32> to vector<128xf32>
    %29 = vector.shape_cast %28 : vector<128xf32> to vector<1x128xf32>
    %c0_20 = arith.constant 0 : index
    %c0_21 = arith.constant 0 : index
    %30 = vector.load %arg9[%c0_20, %c0_21] : memref<1x1xf32, #tpu.memory_space<vmem>>, vector<1x1xf32>
    %31 = vector.broadcast %30 : vector<1x1xf32> to vector<1x128xf32>
    %32 = arith.addf %29, %31 : vector<1x128xf32>
    %c0_22 = arith.constant 0 : index
    %c0_23 = arith.constant 0 : index
    %33 = vector.load %arg10[%c0_22, %c0_23] : memref<1x128xf32, #tpu.memory_space<vmem>>, vector<1x128xf32>
    tpu.vector_store %arg10[%c0_22, %c0_23], %32 {strides = array<i32>} : memref<1x128xf32, #tpu.memory_space<vmem>>, vector<1x128xf32>,
    return
  }
  func.func @transform_0(%arg0: i32) -> (i32, i32) {
    %c0_i32 = arith.constant 0 : i32
    %c0_i32_0 = arith.constant 0 : i32
    return %c0_i32, %arg0 : i32, i32
  }
  func.func @transform_1(%arg0: i32) -> (i32, i32) {
    %c0_i32 = arith.constant 0 : i32
    %c0_i32_0 = arith.constant 0 : i32
    %c0_i32_1 = arith.constant 0 : i32
    return %c0_i32, %c0_i32_0 : i32, i32
  }
  func.func @transform_2(%arg0: i32) -> (i32, i32) {
    %c0_i32 = arith.constant 0 : i32
    %c0_i32_0 = arith.constant 0 : i32
    %c0_i32_1 = arith.constant 0 : i32
    return %c0_i32, %c0_i32_0 : i32, i32
  }
  func.func @transform_3(%arg0: i32) -> (i32, i32) {
    %c0_i32 = arith.constant 0 : i32
    %c0_i32_0 = arith.constant 0 : i32
    %c0_i32_1 = arith.constant 0 : i32
    return %c0_i32, %c0_i32_0 : i32, i32
  }
  func.func @transform_4(%arg0: i32) -> (i32, i32) {
    %c0_i32 = arith.constant 0 : i32
    %c0_i32_0 = arith.constant 0 : i32
    %c0_i32_1 = arith.constant 0 : i32
    return %c0_i32, %c0_i32_0 : i32, i32
  }
  func.func @transform_5(%arg0: i32) -> (i32, i32) {
    %c0_i32 = arith.constant 0 : i32
    %c0_i32_0 = arith.constant 0 : i32
    %c0_i32_1 = arith.constant 0 : i32
    return %c0_i32, %c0_i32_0 : i32, i32
  }
  func.func @transform_6(%arg0: i32) -> (i32, i32) {
    %c0_i32 = arith.constant 0 : i32
    %c0_i32_0 = arith.constant 0 : i32
    %c0_i32_1 = arith.constant 0 : i32
    return %c0_i32, %c0_i32_0 : i32, i32
  }
  func.func @transform_7(%arg0: i32) -> (i32, i32) {
    %c0_i32 = arith.constant 0 : i32
    %c0_i32_0 = arith.constant 0 : i32
    %c0_i32_1 = arith.constant 0 : i32
    return %c0_i32, %c0_i32_0 : i32, i32
  }
  func.func @transform_8(%arg0: i32) -> (i32, i32) {
    %c0_i32 = arith.constant 0 : i32
    %c0_i32_0 = arith.constant 0 : i32
    %c0_i32_1 = arith.constant 0 : i32
    return %c0_i32, %c0_i32_0 : i32, i32
  }
  func.func @transform_9(%arg0: i32) -> (i32, i32) {
    %c0_i32 = arith.constant 0 : i32
    %c0_i32_0 = arith.constant 0 : i32
    return %c0_i32, %arg0 : i32, i32
  }
}

</mosaic_0001>

<bundles_post_ra>
// kernel: tpu_custom_call.1
= control target key start
LH: loop header
LB: loop body
LE: loop exit
PB: predicated region body
PF: predicated region fallthrough
CT: control target
= control target key end

     0   :  { %s514_s0 = inlined_call_operand.vmem [shape: f32[1,128], index: 0, kind: input, shape index: {}]   ;;  %s515_s1 = inlined_call_operand.vmem [shape: f32[32,1], index: 1, kind: input, shape index: {}]   ;;  %s516_s2 = inlined_call_operand.vmem [shape: f32[32,1], index: 2, kind: input, shape index: {}]   ;;  %s517_s3 = inlined_call_operand.vmem [shape: f32[16,32], index: 3, kind: input, shape index: {}]   ;;  %s518_s4 = inlined_call_operand.vmem [shape: f32[16,1], index: 4, kind: input, shape index: {}]   ;;  %s519_s5 = inlined_call_operand.vmem [shape: f32[8,16], index: 5, kind: input, shape index: {}]   ;;  %s520_s6 = inlined_call_operand.vmem [shape: f32[8,1], index: 6, kind: input, shape index: {}]   ;;  %s521_s7 = inlined_call_operand.vmem [shape: f32[8,1], index: 7, kind: input, shape index: {}]   ;;  %s522_s8 = inlined_call_operand.<no memory space> [shape: f32[1,1], index: 8, kind: input, shape index: {}]   ;;  %s523_s9 = inlined_call_operand.hbm [shape: f32[1,128], index: 9, kind: output, shape index: {}]  }
   0x1   :  { %v14_v0 = vstv %s522_s8 }
   0x2   :  { %15 = vst [vmem:[#allocation2] sm:$0x1] %v14_v0 }
   0x3   :  { %v70_v1 = vld [vmem:[%s516_s2] sm:$0xff]  ;;  %v394_v3 = vmov 0   ;;  %v71_v4 = vld [vmem:[%s516_s2 + $0x8] sm:$0xff] }
   0x4   :  { %v42_v2 = vld [vmem:[%s515_s1] sm:$0xff]  ;;  %369 = vset.pattern.permute.xlu1 %v394_v3  ;;  %368 = vset.pattern.permute.xlu0 %v394_v3  ;;  %v43_v5 = vld [vmem:[%s515_s1 + $0x8] sm:$0xff] }
   0x5   :  { %76 = vperm.xlu1 %369, %v70_v1   ;;  %48 = vperm.xlu0 %368, %v42_v2  }
   0x6   :  { %16 = vsyncpa [#allocation4], 0  ;;  %v45_v6 = vld [vmem:[%s515_s1 + $0x18] sm:$0xff]  ;;  %v44_v7 = vld [vmem:[%s515_s1 + $0x10] sm:$0xff]  ;;  %vm116_vm0 = vcmask 261120   ;;  %v395_v40 = vmov 0.0|0.0   ;;  %v301_v58 = vlaneseq }
   0x7   :  { %v73_v8 = vld [vmem:[%s516_s2 + $0x18] sm:$0xff]  ;;  %v72_v9 = vld [vmem:[%s516_s2 + $0x10] sm:$0xff]  ;;  %v105_v10 = vld [vmem:[%s518_s4 + $0x8] sm:$0xff]  ;;  %360 = vmatprep.subr.bf16.mxu1 %v395_v40  ;;  %vm396_vm1 = vmmov 0   ;;  %v397_v41 = vmov 0.0   ;;  %vm207_vm2 = vcmask 130048  }
   0x8   :  { %v104_v11 = vld [vmem:[%s518_s4] sm:$0xff]  ;;  %v103_v39 = vld [vmem:[%s517_s3 + $0x8] sm:$0xff]  ;;  %349 = vmatprep.mubr.msk.f32.mxu1 %vm396_vm1, %v397_v41  ;;  %v302_v61 = vshrl.u32 %v301_v58, 7 }
   0x9   :  { %81 = vperm.xlu1 %369, %v71_v4   ;;  %53 = vperm.xlu0 %368, %v43_v5   ;;  %v282_v12 = vld [vmem:[%s521_s7] sm:$0xff] }
   0xa   :  { %v201_v13 = vld [vmem:[%s520_s6] sm:$0xff]  ;;  %v303_v0 = vsub.s32 0, %v302_v61 }
   0xb   :  { %v102_v14 = vld [vmem:[%s517_s3] sm:$0xff]  ;;  %s398_s3 = smov [#allocation3]  }
   0xc   :  { %v295_v15 = vld [vmem:[#allocation2] sm:$0x1]  ;;  %342 = vmatprep.mubr.msk.f32.mxu0 %vm116_vm0, %v102_v14 }
   0xd   :  { %63 = vperm.xlu1 %369, %v45_v6   ;;  %58 = vperm.xlu0 %368, %v44_v7   ;;  %v321_v16 = vld [vmem:[%s514_s0] ss:$0 sm:$0xff] }
   0xe   :  { %v200_v51 = vld [vmem:[%s519_s5] sm:$0xff]  ;;  %s313_s5 = sshll.u32 %s398_s3, 4  ;;  %s314_s5 = int_to_ptr.vmem [resolvable:$true] %s313_s5 }
   0xf   :  { %s370_s15 = scalar_lea.vmem %s314_s5, 16  ;;  %s374_s16 = scalar_lea.vmem %s314_s5, 32 }
  0x10   :  { %p371_p0 = scmp.ne.s32.totalorder %s314_s5, %s370_s15  ;;  %p375_p1 = scmp.lt.s32.totalorder %s314_s5, %s314_s5 }
  0x11   :  { %91 = vperm.xlu1 %369, %v73_v8   ;;  %86 = vperm.xlu0 %368, %v72_v9   ;;  %p376_p2 = scmp.lt.s32.totalorder %s374_s16, %s370_s15 }
  0x13   :  { %p377_p3 = por %p376_p2, %p375_p1 }
  0x15   :  { %113 = vperm.xlu1 %369, %v105_v10   ;;  %108 = vperm.xlu0 %368, %v104_v11   ;;  %p378_p4 = pnand %p377_p3, %p371_p0 }
  0x19   :  { %285 = vperm.xlu1 %369, %v282_v12   ;;  %204 = vperm.xlu0 %368, %v201_v13  }
  0x1d   :  { %298 = vperm.xlu0 %368, %v295_v15  }
  0x84   :  { %v77_v17 = vpop.permute.xlu1 %76  ;;  %v49_v18 = vpop.permute.xlu0 %48 }
  0x85   :  { %v66_v19 = vmul.f32 %v321_v16, %v49_v18 }
  0x87   :  { %v94_v22 = vadd.f32 %v77_v17, %v66_v19 }
  0x88   :  { %v82_v20 = vpop.permute.xlu1 %81  ;;  %v54_v21 = vpop.permute.xlu0 %53 }
  0x89   :  { %v67_v23 = vmul.f32 %v321_v16, %v54_v21  ;;  %v98_v27 = vmax.f32 %v94_v22, 0.0 }
  0x8b   :  { %v95_v24 = vadd.f32 %v82_v20, %v67_v23 }
  0x8c   :  { %v64_v25 = vpop.permute.xlu1 %63  ;;  %v59_v26 = vpop.permute.xlu0 %58 }
  0x8d   :  { %v99_v28 = vmax.f32 %v95_v24, 0.0  ;;  %v69_v29 = vmul.f32 %v321_v16, %v64_v25  ;;  %v68_v30 = vmul.f32 %v321_v16, %v59_v26 }
  0x8f   :  { %v352_v31 = vpack.c.bf16 %v99_v28, %v98_v27 }
  0x90   :  { %v92_v32 = vpop.permute.xlu1 %91  ;;  %v87_v33 = vpop.permute.xlu0 %86 }
  0x91   :  { %v97_v34 = vadd.f32 %v92_v32, %v69_v29  ;;  %v96_v35 = vadd.f32 %v87_v33, %v68_v30  ;;  %353 = vmatprep.subr.bf16.mxu0 %v352_v31 }
  0x92   :  { %355 = vmatpush3.bf16.msra.mxu0 %v352_v31 }
  0x93   :  { %v101_v36 = vmax.f32 %v97_v34, 0.0  ;;  %v100_v37 = vmax.f32 %v96_v35, 0.0 }
  0x94   :  { %v114_v42 = vpop.permute.xlu1 %113  ;;  %v109_v44 = vpop.permute.xlu0 %108 }
  0x95   :  { %v356_v38 = vpack.c.bf16 %v101_v36, %v100_v37 }
  0x97   :  { %357 = vmatprep.subr.bf16.mxu0 %v356_v38 }
  0x98   :  { %359 = vmatpush3.bf16.msra.mxu0 %v356_v38  ;;  %v205_v52 = vpop.permute.xlu0 %204  ;;  %v286_v57 = vpop.permute.xlu1 %285 }
  0x9b   :  { %343 = vmatmul.mubr.msk.f32.vlgmr.msra.gmra.mrb[0].mxu0 %vm116_vm0, %v103_v39 }
  0x9c   :  { %v299_v2 = vpop.permute.xlu0 %298 }
  0x9d   :  { %v304_v4 = vrot.slane %v299_v2, %v303_v0 }
 0x16e   :  { %v344_v43 = vpop.f32.mrb[0].mxu0 }
 0x16f   :  { %v195_v45 = vadd.f32 %v344_v43, %v114_v42  ;;  %v189_v46 = vpop.f32.mrb[1].mxu0 }
 0x170   :  { %v190_v47 = vadd.f32 %v189_v46, %v109_v44 }
 0x171   :  { %v199_v48 = vmax.f32 %v195_v45, 0.0 }
 0x172   :  { %v198_v49 = vmax.f32 %v190_v47, 0.0 }
 0x174   :  { %v361_v50 = vpack.c.bf16 %v199_v48, %v198_v49 }
 0x176   :  { %362 = vmatpush3.bf16.msra.mxu1 %v361_v50 }
 0x179   :  { %350 = vmatmul.mubr.msk.f32.vlgmr.msra.gmra.mrb[0].mxu1 %vm207_vm2, %v200_v51 }
 0x24c   :  { %v277_v53 = vpop.f32.mrb[0].mxu1 }
 0x24d   :  { %v278_v54 = vadd.f32 %v277_v53, %v205_v52  ;;  %v351_v55 = vpop.f32.mrb[1].mxu1 }
 0x24f   :  { %v281_v56 = vmax.f32 %v278_v54, 0.0 }
 0x251   :  { %v288_v59 = vmul.f32 %v286_v57, %v281_v56 }
 0x253   :  { %v289_v60 = vrot.slane %v288_v59, 4 }
 0x255   :  { %v290_v62 = vadd.f32 %v289_v60, %v288_v59 }
 0x257   :  { %v291_v63 = vrot.slane %v290_v62, 2 }
 0x259   :  { %v292_v1 = vadd.f32 %v291_v63, %v290_v62 }
 0x25b   :  { %v293_v3 = vrot.slane %v292_v1, 1 }
 0x25d   :  { %v294_v5 = vadd.f32 %v293_v3, %v292_v1 }
 0x25f   :  { %v305_v6 = vadd.f32 %v304_v4, %v294_v5 }
 0x261   :  { %306 = vst [vmem:[#allocation3] sm:$0x1] %v305_v6 }
 0x262   :  { %381 = shalt.err (!%p378_p4)
}
 0x263   :  { %s382_s18 = scalar_lea.hbm %s523_s9, 16 }
 0x264   :  { %p383_p5 = scmp.ne.s32.totalorder %s523_s9, %s382_s18  ;;  %p386_p6 = scmp.lt.u32.totalorder %s382_s18, %s523_s9 }
 0x266   :  { %p388_p7 = pnand %p386_p6, %p383_p5 }
 0x268   :  { %391 = shalt.err (!%p388_p7)
}
 0x269   :  { %316 = dma.vmem_to_hbm [thread:$0]  %s314_s5, 16, %s523_s9, [#allocation4]  }
 0x26a   :  { %392 = dma.done.wait [#allocation4], 16  }
 0x26b   :  { %393 = vsyncadd [#allocation4], 4294967280 }
 0x26c   :  { %320 = vsyncpa [#allocation4], 1 }

</bundles_post_ra>
